<compile_context>
chip_gen: v6e
topology: v6e:2x2x1
jax: 0.10.0
libtpu: 0.0.40
codegen_flags: <defaults>
</compile_context>

<pallas_src>
import functools

import jax
import jax.numpy as jnp
from jax.experimental import pallas as pl
from jax.experimental.pallas import tpu as pltpu


def _cdiv(a, b):
    return -(-a // b)


def _gmm_kernel(xT_ref, w0T_ref, b0_ref, w1mT_ref, b1m_ref, w1vT_ref, b1v_ref,
                wmuT_ref, bmu_ref, rT_ref, mean_ref, var_ref, *, use_tanh):
    # Layer 0 for ALL models at once (lane axis = batch):
    #   (M*H, I) @ (I, tb) -> (M*H, tb), f32 accumulation on the MXU.
    hT = jnp.dot(w0T_ref[...], xT_ref[...], preferred_element_type=jnp.float32)
    hT = jnp.maximum(hT + b0_ref[...], 0.0)                     # relu, bias f32
    hT_bf = hT.astype(jnp.bfloat16)                             # bf16 MXU operand

    # Layer 1 per-model heads (block-diagonal weights, transposed):
    #   (M*O, M*H) @ (M*H, tb) -> (M*O, tb)
    meanT = jnp.dot(w1mT_ref[...], hT_bf,
                    preferred_element_type=jnp.float32) + b1m_ref[...]
    rawvT = jnp.dot(w1vT_ref[...], hT_bf,
                    preferred_element_type=jnp.float32) + b1v_ref[...]
    varT = jax.nn.softplus(rawvT)                               # EUP, f32

    rT = rT_ref[...]                                            # (O, M*O), f32
    if use_tanh:
        meanT = (jnp.tanh(meanT) + 1.0) * 0.5
        muT = jnp.dot(rT, meanT, preferred_element_type=jnp.float32)
    else:
        # Folded dense mean path: mixture mean comes straight from h through a
        # dense (O, M*H) head that already contains the 1/M average.
        muT = jnp.dot(wmuT_ref[...], hT_bf,
                      preferred_element_type=jnp.float32) + bmu_ref[...]

    # Mixture second moment: (O, M*O) @ (M*O, tb) -> (O, tb)
    em2T = jnp.dot(rT, varT + meanT * meanT,
                   preferred_element_type=jnp.float32)
    # Clamp: floating-point cancellation can produce tiny negative variance.
    vT = jnp.maximum(em2T - muT * muT, 0.0)

    mean_ref[...] = muT.astype(mean_ref.dtype)
    var_ref[...] = vT.astype(var_ref.dtype)


def pack_params(params, compute_dtype=jnp.bfloat16):
    """One-time host-side packing (call at parameter-prep time, not per step).

    params: (w0 [M,I,H], b0 [M,1,H], w1 [M,H,2O], b1 [M,1,2O])
    """
    w0, b0, w1, b1 = params
    num_models, n_in, n_hidden = w0.shape
    n_out = w1.shape[2] // 2
    mh = num_models * n_hidden
    mo = num_models * n_out

    # Layer 0, transposed & concatenated over models: (M*H, I), bias (M*H, 1).
    w0T = jnp.transpose(w0, (0, 2, 1)).reshape(mh, n_in).astype(compute_dtype)
    b0c = b0.reshape(mh, 1).astype(jnp.float32)

    # Layer 1 mean / variance halves, block-diagonal & transposed: (M*O, M*H).
    w1m = w1[:, :, :n_out]                      # (M, H, O)
    w1v = w1[:, :, n_out:]
    eye_m = jnp.eye(num_models, dtype=w1.dtype)

    def block_diag_T(w_half):                   # -> (M*O, M*H)
        return jnp.einsum('mho,mn->monh', w_half, eye_m).reshape(mo, mh)

    w1mT = block_diag_T(w1m).astype(compute_dtype)
    w1vT = block_diag_T(w1v).astype(compute_dtype)
    b1mT = b1[:, 0, :n_out].reshape(mo, 1).astype(jnp.float32)
    b1vT = b1[:, 0, n_out:].reshape(mo, 1).astype(jnp.float32)

    # Folded dense mixture-mean head: (O, M*H), includes the 1/M average.
    wmuT = (jnp.transpose(w1m, (2, 0, 1)).reshape(n_out, mh)
            / num_models).astype(compute_dtype)
    bmuT = jnp.mean(b1[:, 0, :n_out], axis=0).reshape(n_out, 1).astype(jnp.float32)

    # Mixture averaging matrix R^T (O, M*O): R^T[o, m*O+o'] = (o == o') / M.
    rT = jnp.tile(jnp.eye(n_out, dtype=jnp.float32), (1, num_models)) / num_models

    packed = (w0T, b0c, w1mT, b1mT, w1vT, b1vT, wmuT, bmuT, rT)
    dims = (num_models, n_in, n_hidden, n_out)
    return packed, dims


def gaussian_mixture_mlp(x, packed_params, *, use_tanh=False):
    """x: [B, inputs] (float32/bfloat16); packed_params: output of pack_params."""
    packed, (num_models, n_in, n_hidden, n_out) = packed_params
    w0T, b0c, w1mT, b1mT, w1vT, b1vT, wmuT, bmuT, rT = packed
    batch = x.shape[0]
    mh = num_models * n_hidden
    mo = num_models * n_out

    # Batch-tile: as large as a conservative VMEM budget for the live f32
    # intermediates allows (dominant term: h^T = mh x tb), lane-aligned.
    vmem_budget = 24 * 1024 * 1024
    bytes_per_col = 4 * (mh + 4 * mo + 4 * n_out) + 2 * (n_in + mh)
    cap = (vmem_budget // bytes_per_col) // 128 * 128
    cap = int(max(256, min(8192, cap)))

    if batch <= cap:
        tb = batch
    else:
        n_tiles = _cdiv(batch, cap)
        tb = _cdiv(_cdiv(batch, n_tiles), 128) * 128
    padded = _cdiv(batch, tb) * tb

    xT = x.T.astype(jnp.bfloat16)                       # (I, B) bf16 MXU operand
    if padded != batch:
        xT = jnp.pad(xT, ((0, 0), (0, padded - batch)))

    const = lambda i: (0, 0)
    btile = lambda i: (0, i)
    kernel = functools.partial(_gmm_kernel, use_tanh=use_tanh)

    meanT, varT = pl.pallas_call(
        kernel,
        out_shape=(jax.ShapeDtypeStruct((n_out, padded), x.dtype),
                   jax.ShapeDtypeStruct((n_out, padded), jnp.float32)),
        grid=(padded // tb,),
        in_specs=[
            pl.BlockSpec((n_in, tb), btile),   # x^T (batch on lanes)
            pl.BlockSpec((mh, n_in), const),   # W0^T concat (bf16)
            pl.BlockSpec((mh, 1), const),      # b0 (f32)
            pl.BlockSpec((mo, mh), const),     # W1 mean, block-diag^T (bf16)
            pl.BlockSpec((mo, 1), const),      # b1 mean (f32)
            pl.BlockSpec((mo, mh), const),     # W1 var, block-diag^T (bf16)
            pl.BlockSpec((mo, 1), const),      # b1 var (f32)
            pl.BlockSpec((n_out, mh), const),  # folded dense mean head (bf16)
            pl.BlockSpec((n_out, 1), const),   # folded mean bias (f32)
            pl.BlockSpec((n_out, mo), const),  # mixture averaging R^T (f32)
        ],
        out_specs=(pl.BlockSpec((n_out, tb), btile),
                   pl.BlockSpec((n_out, tb), btile)),
        compiler_params=pltpu.CompilerParams(
            dimension_semantics=("parallel",),
            vmem_limit_bytes=48 * 1024 * 1024),
    )(xT, w0T, b0c, w1mT, b1mT, w1vT, b1vT, wmuT, bmuT, rT)

    mean = meanT[:, :batch].T
    variance = varT[:, :batch].T
    return mean, variance


def _init_params(key, num_models, n_in, n_hidden, n_out):
    """Deterministic nn.Linear-style uniform(-1/sqrt(fan_in), 1/sqrt(fan_in)) init."""
    def u(k, shape, fan_in):
        bound = 1.0 / jnp.sqrt(jnp.float32(fan_in))
        return jax.random.uniform(k, shape, jnp.float32, -bound, bound)

    k0, k1, k2, k3 = jax.random.split(key, 4)
    w0 = u(k0, (num_models, n_in, n_hidden), n_in)            # layer_0 weight (pre-T)
    b0 = u(k1, (num_models, 1, n_hidden), n_in)               # layer_0 bias
    w1 = u(k2, (num_models, n_hidden, 2 * n_out), n_hidden)   # layer_1 weight (pre-T)
    b1 = u(k3, (num_models, 1, 2 * n_out), n_hidden)          # layer_1 bias
    return w0, b0, w1, b1


def _reference(x, params, n_out, use_tanh=False):
    """Pure-JAX f32 mirror of the PyTorch forward for validation."""
    w0, b0, w1, b1 = params
    means, variances = [], []
    for i in range(w0.shape[0]):
        h = jnp.maximum(x @ w0[i] + b0[i], 0.0)
        out = h @ w1[i] + b1[i]
        mu = out[:, :n_out]
        v = jax.nn.softplus(out[:, n_out:2 * n_out])   # == log(1+exp) in this regime
        if use_tanh:
            mu = (jnp.tanh(mu) + 1.0) / 2.0
        means.append(mu)
        variances.append(v)
    means = jnp.stack(means)
    variances = jnp.stack(variances)
    mean = means.mean(axis=0)
    variance = (variances + means ** 2).mean(axis=0) - mean ** 2
    return mean, variance


if __name__ == "__main__":
    # Small shapes consistent with the module's forward:
    #   num_models=3 ensemble members, batch=8, inputs=4, hidden=[32], outputs=2
    NUM_MODELS, BATCH, N_IN, N_HIDDEN, N_OUT = 3, 8, 4, 32, 2

    key = jax.random.PRNGKey(0)
    kp, kx = jax.random.split(key)
    params = _init_params(kp, NUM_MODELS, N_IN, N_HIDDEN, N_OUT)
    x = jax.random.normal(kx, (BATCH, N_IN), jnp.float32)

    # Pack once (hoisted out of the forward), then run the Pallas forward.
    packed_params = pack_params(params)
    fwd = jax.jit(functools.partial(gaussian_mixture_mlp,
                                    packed_params=packed_params, use_tanh=False))
    mean, variance = fwd(x)
    jax.block_until_ready((mean, variance))

    ref_mean, ref_var = _reference(x, params, N_OUT, use_tanh=False)
    assert mean.shape == (BATCH, N_OUT) and variance.shape == (BATCH, N_OUT)
    # bf16 MXU operands vs f32 reference -> modest tolerance.
    assert jnp.allclose(mean, ref_mean, atol=3e-2, rtol=3e-2)
    assert jnp.allclose(variance, ref_var, atol=3e-2, rtol=3e-2)

    print("KERNEL_OK")
</pallas_src>

<mosaic_0001>
module attributes {stable_mosaic.version = 11 : i64} {
  func.func @_gmm_kernel(%arg0: i32, %arg1: memref<4x8xbf16, #tpu.memory_space<vmem>>, %arg2: memref<96x4xbf16, #tpu.memory_space<vmem>>, %arg3: memref<96x1xf32, #tpu.memory_space<vmem>>, %arg4: memref<6x96xbf16, #tpu.memory_space<vmem>>, %arg5: memref<6x1xf32, #tpu.memory_space<vmem>>, %arg6: memref<6x96xbf16, #tpu.memory_space<vmem>>, %arg7: memref<6x1xf32, #tpu.memory_space<vmem>>, %arg8: memref<2x96xbf16, #tpu.memory_space<vmem>>, %arg9: memref<2x1xf32, #tpu.memory_space<vmem>>, %arg10: memref<2x6xf32, #tpu.memory_space<vmem>>, %arg11: memref<2x8xf32, #tpu.memory_space<vmem>>, %arg12: memref<2x8xf32, #tpu.memory_space<vmem>>) attributes {dimension_semantics = [#tpu.dimension_semantics<parallel>], iteration_bounds = array<i64: 1>, scalar_prefetch = 0 : i64, scratch_operands = 0 : i64, tpu.core_type = #tpu.core_type<tc>, window_params = [{transform_indices = @transform_0, window_bounds = array<i64: 4, 8>}, {pipeline_mode = #tpu.pipeline_mode<synchronous>, transform_indices = @transform_1, window_bounds = array<i64: 96, 4>}, {pipeline_mode = #tpu.pipeline_mode<synchronous>, transform_indices = @transform_2, window_bounds = array<i64: 96, 1>}, {pipeline_mode = #tpu.pipeline_mode<synchronous>, transform_indices = @transform_3, window_bounds = array<i64: 6, 96>}, {pipeline_mode = #tpu.pipeline_mode<synchronous>, transform_indices = @transform_4, window_bounds = array<i64: 6, 1>}, {pipeline_mode = #tpu.pipeline_mode<synchronous>, transform_indices = @transform_5, window_bounds = array<i64: 6, 96>}, {pipeline_mode = #tpu.pipeline_mode<synchronous>, transform_indices = @transform_6, window_bounds = array<i64: 6, 1>}, {pipeline_mode = #tpu.pipeline_mode<synchronous>, transform_indices = @transform_7, window_bounds = array<i64: 2, 96>}, {pipeline_mode = #tpu.pipeline_mode<synchronous>, transform_indices = @transform_8, window_bounds = array<i64: 2, 1>}, {pipeline_mode = #tpu.pipeline_mode<synchronous>, transform_indices = @transform_9, window_bounds = array<i64: 2, 6>}, {transform_indices = @transform_10, window_bounds = array<i64: 2, 8>}, {transform_indices = @transform_11, window_bounds = array<i64: 2, 8>}]} {
    %c0 = arith.constant 0 : index
    %c0_0 = arith.constant 0 : index
    %0 = vector.load %arg2[%c0, %c0_0] : memref<96x4xbf16, #tpu.memory_space<vmem>>, vector<96x4xbf16>
    %c0_1 = arith.constant 0 : index
    %c0_2 = arith.constant 0 : index
    %1 = vector.load %arg1[%c0_1, %c0_2] : memref<4x8xbf16, #tpu.memory_space<vmem>>, vector<4x8xbf16>
    %cst = arith.constant dense<0.000000e+00> : vector<96x8xf32>
    %2 = tpu.matmul %0, %1, %cst {dimension_numbers = #tpu.dot_dimension_numbers<[1], [0], [0], [1], [0, 0, 1, 1], [], []>} : vector<96x4xbf16>, vector<4x8xbf16>, vector<96x8xf32> -> vector<96x8xf32>
    %c0_3 = arith.constant 0 : index
    %c0_4 = arith.constant 0 : index
    %3 = vector.load %arg3[%c0_3, %c0_4] : memref<96x1xf32, #tpu.memory_space<vmem>>, vector<96x1xf32>
    %4 = vector.broadcast %3 : vector<96x1xf32> to vector<96x8xf32>
    %5 = arith.addf %2, %4 : vector<96x8xf32>
    %cst_5 = arith.constant 0.000000e+00 : f32
    %6 = vector.broadcast %cst_5 : f32 to vector<96x8xf32>
    %7 = arith.maximumf %5, %6 : vector<96x8xf32>
    %8 = arith.truncf %7 : vector<96x8xf32> to vector<96x8xbf16>
    %c0_6 = arith.constant 0 : index
    %c0_7 = arith.constant 0 : index
    %9 = vector.load %arg4[%c0_6, %c0_7] : memref<6x96xbf16, #tpu.memory_space<vmem>>, vector<6x96xbf16>
    %cst_8 = arith.constant dense<0.000000e+00> : vector<6x8xf32>
    %10 = tpu.matmul %9, %8, %cst_8 {dimension_numbers = #tpu.dot_dimension_numbers<[1], [0], [0], [1], [0, 0, 1, 1], [], []>} : vector<6x96xbf16>, vector<96x8xbf16>, vector<6x8xf32> -> vector<6x8xf32>
    %c0_9 = arith.constant 0 : index
    %c0_10 = arith.constant 0 : index
    %11 = vector.load %arg5[%c0_9, %c0_10] : memref<6x1xf32, #tpu.memory_space<vmem>>, vector<6x1xf32>
    %12 = vector.broadcast %11 : vector<6x1xf32> to vector<6x8xf32>
    %13 = arith.addf %10, %12 : vector<6x8xf32>
    %c0_11 = arith.constant 0 : index
    %c0_12 = arith.constant 0 : index
    %14 = vector.load %arg6[%c0_11, %c0_12] : memref<6x96xbf16, #tpu.memory_space<vmem>>, vector<6x96xbf16>
    %cst_13 = arith.constant dense<0.000000e+00> : vector<6x8xf32>
    %15 = tpu.matmul %14, %8, %cst_13 {dimension_numbers = #tpu.dot_dimension_numbers<[1], [0], [0], [1], [0, 0, 1, 1], [], []>} : vector<6x96xbf16>, vector<96x8xbf16>, vector<6x8xf32> -> vector<6x8xf32>
    %c0_14 = arith.constant 0 : index
    %c0_15 = arith.constant 0 : index
    %16 = vector.load %arg7[%c0_14, %c0_15] : memref<6x1xf32, #tpu.memory_space<vmem>>, vector<6x1xf32>
    %17 = vector.broadcast %16 : vector<6x1xf32> to vector<6x8xf32>
    %18 = arith.addf %15, %17 : vector<6x8xf32>
    %cst_16 = arith.constant 0.000000e+00 : f32
    %19 = vector.broadcast %cst_16 : f32 to vector<6x8xf32>
    %20 = arith.maximumf %18, %19 : vector<6x8xf32>
    %21 = vector.broadcast %cst_16 : f32 to vector<6x8xf32>
    %22 = arith.subf %18, %21 : vector<6x8xf32>
    %23 = arith.cmpf one, %22, %22 : vector<6x8xf32>
    %24 = vector.broadcast %cst_16 : f32 to vector<6x8xf32>
    %25 = arith.addf %18, %24 : vector<6x8xf32>
    %26 = math.absf %22 : vector<6x8xf32>
    %cst_17 = arith.constant 0.000000e+00 : f32
    %27 = vector.broadcast %cst_17 : f32 to vector<6x8xf32>
    %28 = arith.subf %27, %26 : vector<6x8xf32>
    %29 = math.exp %28 : vector<6x8xf32>
    %30 = math.log1p %29 : vector<6x8xf32>
    %31 = arith.addf %20, %30 : vector<6x8xf32>
    %32 = arith.select %23, %25, %31 : vector<6x8xi1>, vector<6x8xf32>
    %c0_18 = arith.constant 0 : index
    %c0_19 = arith.constant 0 : index
    %33 = vector.load %arg10[%c0_18, %c0_19] : memref<2x6xf32, #tpu.memory_space<vmem>>, vector<2x6xf32>
    %c0_20 = arith.constant 0 : index
    %c0_21 = arith.constant 0 : index
    %34 = vector.load %arg8[%c0_20, %c0_21] : memref<2x96xbf16, #tpu.memory_space<vmem>>, vector<2x96xbf16>
    %cst_22 = arith.constant dense<0.000000e+00> : vector<2x8xf32>
    %35 = tpu.matmul %34, %8, %cst_22 {dimension_numbers = #tpu.dot_dimension_numbers<[1], [0], [0], [1], [0, 0, 1, 1], [], []>} : vector<2x96xbf16>, vector<96x8xbf16>, vector<2x8xf32> -> vector<2x8xf32>
    %c0_23 = arith.constant 0 : index
    %c0_24 = arith.constant 0 : index
    %36 = vector.load %arg9[%c0_23, %c0_24] : memref<2x1xf32, #tpu.memory_space<vmem>>, vector<2x1xf32>
    %37 = vector.broadcast %36 : vector<2x1xf32> to vector<2x8xf32>
    %38 = arith.addf %35, %37 : vector<2x8xf32>
    %39 = arith.mulf %13, %13 : vector<6x8xf32>
    %40 = arith.addf %32, %39 : vector<6x8xf32>
    %cst_25 = arith.constant dense<0.000000e+00> : vector<2x8xf32>
    %41 = tpu.matmul %33, %40, %cst_25 {dimension_numbers = #tpu.dot_dimension_numbers<[1], [0], [0], [1], [0, 0, 1, 1], [], []>} : vector<2x6xf32>, vector<6x8xf32>, vector<2x8xf32> -> vector<2x8xf32>
    %42 = arith.mulf %38, %38 : vector<2x8xf32>
    %43 = arith.subf %41, %42 : vector<2x8xf32>
    %cst_26 = arith.constant 0.000000e+00 : f32
    %44 = vector.broadcast %cst_26 : f32 to vector<2x8xf32>
    %45 = arith.maximumf %43, %44 : vector<2x8xf32>
    %c0_27 = arith.constant 0 : index
    %c0_28 = arith.constant 0 : index
    %46 = vector.load %arg11[%c0_27, %c0_28] : memref<2x8xf32, #tpu.memory_space<vmem>>, vector<2x8xf32>
    tpu.vector_store %arg11[%c0_27, %c0_28], %38 {strides = array<i32>} : memref<2x8xf32, #tpu.memory_space<vmem>>, vector<2x8xf32>,
    %c0_29 = arith.constant 0 : index
    %c0_30 = arith.constant 0 : index
    %47 = vector.load %arg12[%c0_29, %c0_30] : memref<2x8xf32, #tpu.memory_space<vmem>>, vector<2x8xf32>
    tpu.vector_store %arg12[%c0_29, %c0_30], %45 {strides = array<i32>} : memref<2x8xf32, #tpu.memory_space<vmem>>, vector<2x8xf32>,
    return
  }
  func.func @transform_0(%arg0: i32) -> (i32, i32) {
    %c0_i32 = arith.constant 0 : i32
    %c0_i32_0 = arith.constant 0 : i32
    return %c0_i32, %arg0 : i32, i32
  }
  func.func @transform_1(%arg0: i32) -> (i32, i32) {
    %c0_i32 = arith.constant 0 : i32
    %c0_i32_0 = arith.constant 0 : i32
    %c0_i32_1 = arith.constant 0 : i32
    return %c0_i32, %c0_i32_0 : i32, i32
  }
  func.func @transform_2(%arg0: i32) -> (i32, i32) {
    %c0_i32 = arith.constant 0 : i32
    %c0_i32_0 = arith.constant 0 : i32
    %c0_i32_1 = arith.constant 0 : i32
    return %c0_i32, %c0_i32_0 : i32, i32
  }
  func.func @transform_3(%arg0: i32) -> (i32, i32) {
    %c0_i32 = arith.constant 0 : i32
    %c0_i32_0 = arith.constant 0 : i32
    %c0_i32_1 = arith.constant 0 : i32
    return %c0_i32, %c0_i32_0 : i32, i32
  }
  func.func @transform_4(%arg0: i32) -> (i32, i32) {
    %c0_i32 = arith.constant 0 : i32
    %c0_i32_0 = arith.constant 0 : i32
    %c0_i32_1 = arith.constant 0 : i32
    return %c0_i32, %c0_i32_0 : i32, i32
  }
  func.func @transform_5(%arg0: i32) -> (i32, i32) {
    %c0_i32 = arith.constant 0 : i32
    %c0_i32_0 = arith.constant 0 : i32
    %c0_i32_1 = arith.constant 0 : i32
    return %c0_i32, %c0_i32_0 : i32, i32
  }
  func.func @transform_6(%arg0: i32) -> (i32, i32) {
    %c0_i32 = arith.constant 0 : i32
    %c0_i32_0 = arith.constant 0 : i32
    %c0_i32_1 = arith.constant 0 : i32
    return %c0_i32, %c0_i32_0 : i32, i32
  }
  func.func @transform_7(%arg0: i32) -> (i32, i32) {
    %c0_i32 = arith.constant 0 : i32
    %c0_i32_0 = arith.constant 0 : i32
    %c0_i32_1 = arith.constant 0 : i32
    return %c0_i32, %c0_i32_0 : i32, i32
  }
  func.func @transform_8(%arg0: i32) -> (i32, i32) {
    %c0_i32 = arith.constant 0 : i32
    %c0_i32_0 = arith.constant 0 : i32
    %c0_i32_1 = arith.constant 0 : i32
    return %c0_i32, %c0_i32_0 : i32, i32
  }
  func.func @transform_9(%arg0: i32) -> (i32, i32) {
    %c0_i32 = arith.constant 0 : i32
    %c0_i32_0 = arith.constant 0 : i32
    %c0_i32_1 = arith.constant 0 : i32
    return %c0_i32, %c0_i32_0 : i32, i32
  }
  func.func @transform_10(%arg0: i32) -> (i32, i32) {
    %c0_i32 = arith.constant 0 : i32
    %c0_i32_0 = arith.constant 0 : i32
    return %c0_i32, %arg0 : i32, i32
  }
  func.func @transform_11(%arg0: i32) -> (i32, i32) {
    %c0_i32 = arith.constant 0 : i32
    %c0_i32_0 = arith.constant 0 : i32
    return %c0_i32, %arg0 : i32, i32
  }
}

</mosaic_0001>

<bundles_post_ra>
// kernel: gaussian_mixture_mlp.1
= control target key start
LH: loop header
LB: loop body
LE: loop exit
PB: predicated region body
PF: predicated region fallthrough
CT: control target
= control target key end

     0   :  { %17 = vsyncpa [#allocation3], 0  ;;  %s1032_s0 = inlined_call_operand.vmem [shape: bf16[4,8], index: 0, kind: input, shape index: {}]   ;;  %s1033_s1 = inlined_call_operand.hbm [shape: bf16[96,4], index: 1, kind: input, shape index: {}]   ;;  %s1034_s2 = inlined_call_operand.hbm [shape: f32[96,1], index: 2, kind: input, shape index: {}]   ;;  %s1035_s3 = inlined_call_operand.hbm [shape: bf16[6,96], index: 3, kind: input, shape index: {}]   ;;  %s1036_s4 = inlined_call_operand.hbm [shape: f32[6,1], index: 4, kind: input, shape index: {}]   ;;  %s1037_s5 = inlined_call_operand.vmem [shape: bf16[6,96], index: 5, kind: input, shape index: {}]   ;;  %s1038_s6 = inlined_call_operand.vmem [shape: f32[6,1], index: 6, kind: input, shape index: {}]   ;;  %s1039_s7 = inlined_call_operand.vmem [shape: bf16[2,96], index: 7, kind: input, shape index: {}]   ;;  %s1040_s8 = inlined_call_operand.vmem [shape: f32[2,1], index: 8, kind: input, shape index: {}]   ;;  %s1041_s9 = inlined_call_operand.vmem [shape: f32[2,6], index: 9, kind: input, shape index: {}]   ;;  %s1042_s10 = inlined_call_operand.hbm [shape: f32[2,8], index: 10, kind: output, shape index: {0}]   ;;  %s1043_s11 = inlined_call_operand.hbm [shape: f32[2,8], index: 11, kind: output, shape index: {1}]  }
   0x1   :  { %18 = vsyncpa [#allocation6], 0 }
   0x2   :  { %19 = vsyncpa [#allocation9], 0 }
   0x3   :  { %20 = vsyncpa [#allocation4], 0 }
   0x4   :  { %21 = vsyncpa [#allocation12], 0  ;;  %s885_s17 = smov [#allocation5]  }
   0x5   :  { %s41_s18 = sshll.u32 %s885_s17, 4  ;;  %s42_s18 = int_to_ptr.vmem [resolvable:$true] %s41_s18 }
   0x6   :  { %s763_s19 = scalar_lea.vmem %s42_s18, 1536  ;;  %p768_p1 = scmp.lt.s32.totalorder %s42_s18, %s42_s18 }
   0x7   :  { %p764_p0 = scmp.ne.s32.totalorder %s42_s18, %s763_s19  ;;  %p769_p2 = scmp.lt.s32.totalorder %s763_s19, %s763_s19 }
   0x9   :  { %p770_p3 = por %p769_p2, %p768_p1 }
   0xb   :  { %p771_p4 = pnand %p770_p3, %p764_p0 }
   0xd   :  { %774 = shalt.err (!%p771_p4)
}
   0xe   :  { %s886_s20 = smov 128   ;;  %s887_s21 = smov 8  }
   0xf   :  { %47 = dma.hbm_to_vmem [thread:$0]  %s1034_s2, 1536, %s42_s18, [#allocation6], %s886_s20, %s886_s20, %s887_s21  }
  0x10   :  { %s888_s24 = smov [#allocation2]  }
  0x11   :  { %s29_s25 = sshll.u32 %s888_s24, 4  ;;  %s30_s25 = int_to_ptr.vmem [resolvable:$true] %s29_s25 }
  0x12   :  { %s783_s26 = scalar_lea.vmem %s30_s25, 768  ;;  %p788_p6 = scmp.lt.s32.totalorder %s30_s25, %s30_s25 }
  0x13   :  { %p784_p5 = scmp.ne.s32.totalorder %s30_s25, %s783_s26  ;;  %p789_p7 = scmp.lt.s32.totalorder %s783_s26, %s783_s26 }
  0x15   :  { %p790_p8 = por %p789_p7, %p788_p6 }
  0x17   :  { %p791_p9 = pnand %p790_p8, %p784_p5 }
  0x19   :  { %794 = shalt.err (!%p791_p9)
}
  0x1a   :  { %s889_s27 = smov 64   ;;  %s890_s28 = smov 4  }
  0x1b   :  { %35 = dma.hbm_to_vmem [thread:$0]  %s1033_s1, 768, %s30_s25, [#allocation3], %s889_s27, %s889_s27, %s890_s28  }
  0x1c   :  { %s891_s12 = smov [#allocation7]   ;;  %s892_s14 = smov [#allocation8]  }
  0x1d   :  { %s54_s13 = sshll.u32 %s891_s12, 4  ;;  %s64_s2 = sshll.u32 %s892_s14, 4  ;;  %s55_s13 = int_to_ptr.vmem [resolvable:$true] %s54_s13  ;;  %s65_s2 = int_to_ptr.vmem [resolvable:$true] %s64_s2 }
  0x1e   :  { %s803_s15 = scalar_lea.vmem %s55_s13, 64  ;;  %p808_p11 = scmp.lt.s32.totalorder %s55_s13, %s55_s13 }
  0x1f   :  { %p804_p10 = scmp.ne.s32.totalorder %s55_s13, %s803_s15  ;;  %p809_p12 = scmp.lt.s32.totalorder %s803_s15, %s803_s15 }
  0x21   :  { %p810_p13 = por %p809_p12, %p808_p11 }
  0x23   :  { %p811_p0 = pnand %p810_p13, %p804_p10 }
  0x25   :  { %814 = shalt.err (!%p811_p0)
}
  0x26   :  { %57 = dma.hbm_to_vmem [thread:$0]  %s1035_s3, 64, %s55_s13, [#allocation6]  }
  0x27   :  { %s823_s18 = scalar_lea.vmem %s65_s2, 128  ;;  %p828_p2 = scmp.lt.s32.totalorder %s65_s2, %s65_s2 }
  0x28   :  { %p824_p1 = scmp.ne.s32.totalorder %s65_s2, %s823_s18  ;;  %p829_p3 = scmp.lt.s32.totalorder %s823_s18, %s823_s18 }
  0x2a   :  { %p830_p4 = por %p829_p3, %p828_p2 }
  0x2c   :  { %p831_p5 = pnand %p830_p4, %p824_p1 }
  0x2e   :  { %834 = shalt.err (!%p831_p5)
}
  0x2f   :  { %67 = dma.hbm_to_vmem [thread:$0]  %s1036_s4, 128, %s65_s2, [#allocation9]  }
  0x30   :  { %875 = dma.done.wait [#allocation3], 768  }
  0x31   :  { %876 = vsyncadd [#allocation3], 4294966528 }
  0x32   :  { %877 = dma.done.wait [#allocation6], 1600  }
  0x33   :  { %878 = vsyncadd [#allocation6], 4294965696 }
  0x34   :  { %879 = dma.done.wait [#allocation9], 128  }
  0x35   :  { %880 = vsyncadd [#allocation9], 4294967168  ;;  %v893_v0 = vmov 0   ;;  %vm225_vm0 = vcmask 1041408   ;;  %vm206_vm1 = vcmask 31744   ;;  %v745_v3 = vld [vmem:[#allocation2] sm:$0xff]  }
  0x36   :  { %743 = vset.pattern.permute.xlu0 %v893_v0  ;;  %744 = vset.pattern.permute.xlu1 %v893_v0  ;;  %v103_v1 = vld [vmem:[%s1032_s0] sm:$0x3]  ;;  %v746_v4 = vld [vmem:[#allocation2 + $0x8] sm:$0xff]   ;;  %v747_v5 = vld [vmem:[#allocation2 + $0x10] sm:$0xff]   ;;  %v894_v24 = vmov 0.0   ;;  %vm895_vm2 = vmmov 0  }
  0x37   :  { %729 = vmatprep.subr.msk.bf16.mxu0 %vm225_vm0, %v103_v1  ;;  %v227_v2 = vsel %vm225_vm0, %v103_v1, 0  ;;  %664 = vmatprep.mubr.msk.bf16.mxu0 %vm206_vm1, %v745_v3  ;;  %v114_v6 = vld [vmem:[#allocation5 + $0x50] sm:$0xff]  ;;  %v112_v7 = vld [vmem:[#allocation5 + $0x40] sm:$0xff]  ;;  %v115_v8 = vld [vmem:[#allocation5 + $0x58] sm:$0xff]  ;;  %vm335_vm3 = vcmask 785408   ;;  %vm581_vm4 = vcmask 58368  }
  0x38   :  { %663 = vmatpush3.bf16.msra.mxu0 %v227_v2  ;;  %168 = vperm.xlu0 %743, %v114_v6   ;;  %v748_v9 = vld [vmem:[#allocation2 + $0x18] sm:$0xff]   ;;  %v749_v11 = vld [vmem:[#allocation2 + $0x20] sm:$0xff]   ;;  %v111_v13 = vld [vmem:[#allocation5 + $0x38] sm:$0xff]  ;;  %vm504_vm7 = vcmask 1045504   ;;  %vm500_vm8 = vcmask 48128   ;;  %s896_s25 = smov [#allocation10]  }
  0x39   :  { %158 = vperm.xlu1 %744, %v112_v7   ;;  %v113_v10 = vld [vmem:[#allocation5 + $0x48] sm:$0xff]  ;;  %v110_v12 = vld [vmem:[#allocation5 + $0x30] sm:$0xff]  ;;  %v108_v14 = vld [vmem:[#allocation5 + $0x20] sm:$0xff]  ;;  %676 = vmatprep.subr.bf16.mxu1 %v894_v24  ;;  %s590_s26 = sshll.u32 %s896_s25, 4  ;;  %s591_s26 = int_to_ptr.vmem [resolvable:$true] %s590_s26 }
  0x3a   :  { %v750_v15 = vld [vmem:[#allocation2 + $0x28] sm:$0xff]   ;;  %v109_v16 = vld [vmem:[#allocation5 + $0x28] sm:$0xff]  ;;  %v106_v17 = vld [vmem:[#allocation5 + $0x10] sm:$0xff]  ;;  %692 = vmatprep.subr.bf16.mxu0 %v894_v24  ;;  %688 = vmatprep.mubr.msk.bf16.mxu1 %vm895_vm2, %v894_v24  ;;  %s835_s27 = scalar_lea.vmem %s591_s26, 32  ;;  %p840_p7 = scmp.lt.s32.totalorder %s591_s26, %s591_s26 }
  0x3b   :  { %665 = vmatmul.mubr.msk.bf16.vlgmr.msra.gmra.mxu0 %vm206_vm1, %v746_v4  ;;  %v107_v18 = vld [vmem:[#allocation5 + $0x18] sm:$0xff]  ;;  %v104_v19 = vld [vmem:[#allocation5] sm:$0xff]  ;;  %v105_v20 = vld [vmem:[#allocation5 + $0x8] sm:$0xff]  ;;  %p836_p6 = scmp.ne.s32.totalorder %s591_s26, %s835_s27  ;;  %p841_p8 = scmp.lt.s32.totalorder %s835_s27, %s835_s27 }
  0x3c   :  { %668 = vmatprep.mubr.msk.bf16.mxu0 %vm206_vm1, %v747_v5  ;;  %173 = vperm.xlu0 %743, %v115_v8   ;;  %v380_v21 = vld [vmem:[%s1038_s6] sm:$0x3f]  ;;  %v329_v22 = vld [vmem:[#allocation8] sm:$0x3f] }
  0x3d   :  { %163 = vperm.xlu1 %744, %v113_v10   ;;  %v449_v23 = vld [vmem:[%s1040_s8] sm:$0x3]  ;;  %p842_p9 = por %p841_p8, %p840_p7 }
  0x3f   :  { %p843_p10 = pnand %p842_p9, %p836_p6 }
  0x40   :  { %148 = vperm.xlu0 %743, %v110_v12  }
  0x41   :  { %153 = vperm.xlu1 %744, %v111_v13  }
  0x43   :  { %669 = vmatmul.mubr.msk.bf16.gmra.mxu0 %vm206_vm1, %v748_v9 }
  0x44   :  { %672 = vmatprep.mubr.msk.bf16.mxu0 %vm206_vm1, %v749_v11  ;;  %138 = vperm.xlu0 %743, %v108_v14  }
  0x45   :  { %143 = vperm.xlu1 %744, %v109_v16   ;;  %v379_v16 = vld [vmem:[%s1037_s5] sm:$0x7] }
  0x48   :  { %128 = vperm.xlu0 %743, %v106_v17   ;;  %v448_v17 = vld [vmem:[%s1039_s7] sm:$0x1] }
  0x49   :  { %133 = vperm.xlu1 %744, %v107_v18  }
  0x4b   :  { %673 = vmatmul.mubr.msk.bf16.gmra.mxu0 %vm206_vm1, %v750_v15  ;;  %v328_v15 = vld [vmem:[#allocation7] sm:$0x7] }
  0x4c   :  { %118 = vperm.xlu0 %743, %v104_v19   ;;  %704 = vmatprep.mubr.msk.bf16.mxu0 %vm895_vm2, %v894_v24 }
  0x4d   :  { %123 = vperm.xlu1 %744, %v105_v20  }
  0x50   :  { %383 = vperm.xlu0 %743, %v380_v21  }
  0x51   :  { %332 = vperm.xlu1 %744, %v329_v22  }
  0x54   :  { %452 = vperm.xlu0 %743, %v449_v23  }
  0xb3   :  { %v169_v29 = vpop.permute.xlu0 %168 }
  0xb4   :  { %v159_v27 = vpop.permute.xlu1 %158 }
  0xb7   :  { %v174_v34 = vpop.permute.xlu0 %173 }
  0xb8   :  { %v164_v32 = vpop.permute.xlu1 %163 }
  0xbb   :  { %v149_v39 = vpop.permute.xlu0 %148 }
  0xbc   :  { %v154_v37 = vpop.permute.xlu1 %153 }
  0xbf   :  { %v139_v50 = vpop.permute.xlu0 %138 }
  0xc0   :  { %v144_v44 = vpop.permute.xlu1 %143 }
  0xc3   :  { %v129_v60 = vpop.permute.xlu0 %128 }
  0xc4   :  { %v134_v56 = vpop.permute.xlu1 %133 }
  0xc7   :  { %v119_v5 = vpop.permute.xlu0 %118 }
  0xc8   :  { %v124_v2 = vpop.permute.xlu1 %123 }
  0xcb   :  { %v384_v18 = vpop.permute.xlu0 %383 }
  0xfb   :  { %v666_v25 = vpop.f32.mrf.mxu0 }
  0xfc   :  { %v272_v3 = vadd.f32 %v666_v25, %v129_v60 }
  0xfd   :  { %v263_v26 = vpop.f32.mrf.mxu0 }
  0xfe   :  { %v312_v9 = vmax.f32 %v272_v3, 0.0  ;;  %v264_v10 = vadd.f32 %v263_v26, %v119_v5 }
  0xff   :  { %v667_v28 = vpop.f32.mrf.mxu0 }
 0x100   :  { %v275_v63 = vadd.f32 %v667_v28, %v134_v56  ;;  %v310_v13 = vmax.f32 %v264_v10, 0.0 }
 0x101   :  { %v266_v30 = vpop.f32.mrf.mxu0 }
 0x102   :  { %v313_v6 = vmax.f32 %v275_v63, 0.0  ;;  %v267_v7 = vadd.f32 %v266_v30, %v124_v2 }
 0x103   :  { %v670_v31 = vpop.f32.mrf.mxu0 }
 0x104   :  { %v288_v54 = vadd.f32 %v670_v31, %v149_v39  ;;  %v323_v11 = vpack.c.bf16 %v313_v6, %v312_v9  ;;  %v311_v12 = vmax.f32 %v267_v7, 0.0 }
 0x105   :  { %v279_v33 = vpop.f32.mrf.mxu0 }
 0x106   :  { %v316_v61 = vmax.f32 %v288_v54, 0.0  ;;  %v280_v62 = vadd.f32 %v279_v33, %v139_v50  ;;  %v322_v14 = vpack.c.bf16 %v311_v12, %v310_v13  ;;  %v453_v33 = vpop.permute.xlu0 %452 }
 0x107   :  { %v671_v35 = vpop.f32.mrf.mxu0 }
 0x108   :  { %v291_v51 = vadd.f32 %v671_v35, %v154_v37  ;;  %v314_v4 = vmax.f32 %v280_v62, 0.0 }
 0x109   :  { %v282_v36 = vpop.f32.mrf.mxu0 }
 0x10a   :  { %v317_v57 = vmax.f32 %v291_v51, 0.0  ;;  %v283_v58 = vadd.f32 %v282_v36, %v144_v44 }
 0x10b   :  { %v674_v38 = vpop.f32.mrf.mxu0 }
 0x10c   :  { %v304_v41 = vadd.f32 %v674_v38, %v169_v29  ;;  %v325_v0 = vpack.c.bf16 %v317_v57, %v316_v61  ;;  %v315_v1 = vmax.f32 %v283_v58, 0.0 }
 0x10d   :  { %v295_v40 = vpop.f32.mrf.mxu0 }
 0x10e   :  { %v320_v46 = vmax.f32 %v304_v41, 0.0  ;;  %v296_v47 = vadd.f32 %v295_v40, %v159_v27  ;;  %v324_v8 = vpack.c.bf16 %v315_v1, %v314_v4 }
 0x10f   :  { %v675_v42 = vpop.f32.mrf.mxu0 }
 0x110   :  { %v307_v43 = vadd.f32 %v675_v42, %v174_v34  ;;  %v318_v55 = vmax.f32 %v296_v47, 0.0 }
 0x111   :  { %v298_v45 = vpop.f32.mrf.mxu0 }
 0x112   :  { %v321_v48 = vmax.f32 %v307_v43, 0.0  ;;  %v299_v49 = vadd.f32 %v298_v45, %v164_v32  ;;  %v333_v43 = vpop.permute.xlu1 %332 }
 0x114   :  { %v327_v52 = vpack.c.bf16 %v321_v48, %v320_v46  ;;  %v319_v53 = vmax.f32 %v299_v49, 0.0 }
 0x116   :  { %677 = vmatpush3.bf16.msra.mxu1 %v327_v52  ;;  %693 = vmatpush3.bf16.msra.mxu0 %v327_v52  ;;  %v326_v59 = vpack.c.bf16 %v319_v53, %v318_v55  ;;  %v447_v53 = vld [vmem:[%s1041_s9] sm:$0x3] }
 0x117   :  { %678 = vmatprep.subr.bf16.mxu1 %v894_v24  ;;  %694 = vmatprep.subr.bf16.mxu0 %v894_v24 }
 0x11a   :  { %679 = vmatpush3.bf16.msra.mxu1 %v326_v59  ;;  %695 = vmatpush3.bf16.msra.mxu0 %v326_v59 }
 0x11b   :  { %680 = vmatprep.subr.bf16.mxu1 %v894_v24  ;;  %696 = vmatprep.subr.bf16.mxu0 %v894_v24 }
 0x11e   :  { %681 = vmatpush3.bf16.msra.mxu1 %v325_v0  ;;  %697 = vmatpush3.bf16.msra.mxu0 %v325_v0 }
 0x11f   :  { %682 = vmatprep.subr.bf16.mxu1 %v894_v24  ;;  %698 = vmatprep.subr.bf16.mxu0 %v894_v24 }
 0x122   :  { %683 = vmatpush3.bf16.msra.mxu1 %v324_v8  ;;  %699 = vmatpush3.bf16.msra.mxu0 %v324_v8 }
 0x123   :  { %684 = vmatprep.subr.bf16.mxu1 %v894_v24  ;;  %700 = vmatprep.subr.bf16.mxu0 %v894_v24 }
 0x126   :  { %685 = vmatpush3.bf16.msra.mxu1 %v323_v11  ;;  %701 = vmatpush3.bf16.msra.mxu0 %v323_v11 }
 0x127   :  { %686 = vmatprep.subr.bf16.mxu1 %v894_v24  ;;  %702 = vmatprep.subr.bf16.mxu0 %v894_v24 }
 0x12a   :  { %687 = vmatpush3.bf16.msra.mxu1 %v322_v14  ;;  %703 = vmatpush3.bf16.msra.mxu0 %v322_v14 }
 0x12b   :  { %708 = vmatprep.subr.bf16.mxu1 %v894_v24  ;;  %724 = vmatprep.subr.mxu0 %v894_v24 }
 0x12d   :  { %689 = vmatmul.mubr.msk.bf16.vlgmr.msra.gmra.mxu1 %vm335_vm3, %v328_v15  ;;  %705 = vmatmul.mubr.msk.bf16.vlgmr.msra.gmra.mxu0 %vm335_vm3, %v379_v16 }
 0x12e   :  { %709 = vmatpush3.bf16.msra.mxu1 %v327_v52  ;;  %720 = vmatprep.mubr.msk.bf16.mxu1 %vm895_vm2, %v894_v24 }
 0x12f   :  { %710 = vmatprep.subr.bf16.mxu1 %v894_v24  ;;  %726 = vmatprep.mubr.msk.f32.mxu0 %vm895_vm2, %v894_v24 }
 0x132   :  { %711 = vmatpush3.bf16.msra.mxu1 %v326_v59 }
 0x133   :  { %712 = vmatprep.subr.bf16.mxu1 %v894_v24 }
 0x136   :  { %713 = vmatpush3.bf16.msra.mxu1 %v325_v0 }
 0x137   :  { %714 = vmatprep.subr.bf16.mxu1 %v894_v24 }
 0x13a   :  { %715 = vmatpush3.bf16.msra.mxu1 %v324_v8 }
 0x13b   :  { %716 = vmatprep.subr.bf16.mxu1 %v894_v24 }
 0x13e   :  { %717 = vmatpush3.bf16.msra.mxu1 %v323_v11 }
 0x13f   :  { %718 = vmatprep.subr.bf16.mxu1 %v894_v24 }
 0x142   :  { %719 = vmatpush3.bf16.msra.mxu1 %v322_v14 }
 0x145   :  { %721 = vmatmul.mubr.msk.bf16.vlgmr.msra.gmra.mxu1 %vm335_vm3, %v448_v17 }
 0x1ed   :  { %v373_v19 = vpop.f32.mrf.mxu1  ;;  %v423_v20 = vpop.f32.mrf.mxu0 }
 0x1ee   :  { %v424_v21 = vadd.f32 %v423_v20, %v384_v18  ;;  %v374_v44 = vadd.f32 %v373_v19, %v333_v43 }
 0x1ef   :  { %v706_v22 = vpop.f32.mrf.mxu0  ;;  %v690_v23 = vpop.f32.mrf.mxu1 }
 0x1f0   :  { %v432_v25 = vand.u32 2147483647, %v424_v21  ;;  %v429_v47 = vmax.f32 %v424_v21, 0.0  ;;  %v498_v50 = vmul.f32 %v374_v44, %v374_v44  ;;  %vm430_vm6 = vcmp.ne.f32.partialorder %v424_v21, %v424_v21 }
 0x1f1   :  { %v426_v26 = vpop.f32.mrf.mxu0  ;;  %v376_v27 = vpop.f32.mrf.mxu1 }
 0x1f2   :  { %v433_v28 = vsub.f32 0.0, %v432_v25 }
 0x1f3   :  { %v707_v29 = vpop.f32.mrf.mxu0  ;;  %v691_v30 = vpop.f32.mrf.mxu1 }
 0x1f4   :  { %v434_v24 = vmul.f32 1.442695, %v433_v28 }
 0x1f6   :  { %751 = vpow2.f32 %v434_v24 }
 0x203   :  { %v752_v31 = vpop.eup %751 }
 0x204   :  { %v436_v32 = vadd.f32 1.0, %v752_v31  ;;  %v439_v39 = vmul.f32 -0.5, %v752_v31  ;;  %v442_v41 = vand.u32 2147483647, %v752_v31 }
 0x205   :  { %v492_v34 = vpop.f32.mrf.mxu1 }
 0x206   :  { %753 = vlog2.f32 %v436_v32  ;;  %v493_v35 = vadd.f32 %v492_v34, %v453_v33  ;;  %v440_v40 = vadd.f32 1.0, %v439_v39  ;;  %vm443_vm5 = vcmp.lt.f32.partialorder %v442_v41, 0.0004427343 }
 0x207   :  { %v722_v36 = vpop.f32.mrf.mxu1 }
 0x208   :  { %582 = vst.msk [vmem:[#allocation10] sm:$0x3] %vm581_vm4, %v493_v35  ;;  %v441_v46 = vmul.f32 %v752_v31, %v440_v40 }
 0x209   :  { %v495_v37 = vpop.f32.mrf.mxu1 }
 0x20b   :  { %v723_v38 = vpop.f32.mrf.mxu1 }
 0x213   :  { %v754_v42 = vpop.eup %753 }
 0x214   :  { %v438_v45 = vmul.f32 0.6931472, %v754_v42 }
 0x216   :  { %v444_v48 = vsel %vm443_vm5, %v441_v46, %v438_v45 }
 0x217   :  { %v445_v49 = vadd.f32 %v444_v48, %v429_v47 }
 0x219   :  { %v446_v51 = vsel %vm430_vm6, %v424_v21, %v445_v49 }
 0x21a   :  { %v499_v52 = vadd.f32 %v498_v50, %v446_v51 }
 0x21c   :  { %725 = vmatpush3.msk.msra.mxu0 %vm504_vm7, %v499_v52 }
 0x21d   :  { %727 = vmatmul.mubr.msk.f32.vlgmr.msra.gmra.mxu0 %vm500_vm8, %v447_v53 }
 0x21e   :  { %846 = shalt.err (!%p843_p10)
}
 0x21f   :  { %593 = dma.vmem_to_hbm [thread:$0]  %s591_s26, 32, %s1042_s10, [#allocation4]   ;;  %v578_v54 = vmul.f32 %v493_v35, %v493_v35 }
 0x220   :  { %s897_s9 = smov [#allocation11]  }
 0x221   :  { %s600_s30 = sshll.u32 %s897_s9, 4  ;;  %s601_s30 = int_to_ptr.vmem [resolvable:$true] %s600_s30 }
 0x222   :  { %s855_s12 = scalar_lea.vmem %s601_s30, 32  ;;  %p860_p12 = scmp.lt.s32.totalorder %s601_s30, %s601_s30 }
 0x223   :  { %p856_p11 = scmp.ne.s32.totalorder %s601_s30, %s855_s12  ;;  %p861_p13 = scmp.lt.s32.totalorder %s855_s12, %s855_s12 }
 0x225   :  { %p862_p0 = por %p861_p13, %p860_p12 }
 0x227   :  { %p863_p1 = pnand %p862_p0, %p856_p11 }
 0x2dd   :  { %v574_v55 = vpop.f32.mrf.mxu0 }
 0x2de   :  { %v579_v56 = vsub.f32 %v574_v55, %v578_v54 }
 0x2df   :  { %v728_v57 = vpop.f32.mrf.mxu0 }
 0x2e0   :  { %v580_v58 = vmax.f32 %v579_v56, 0.0 }
 0x2e2   :  { %583 = vst.msk [vmem:[#allocation11] sm:$0x3] %vm581_vm4, %v580_v58 }
 0x2e3   :  { %866 = shalt.err (!%p863_p1)
}
 0x2e4   :  { %603 = dma.vmem_to_hbm [thread:$0]  %s601_s30, 32, %s1043_s11, [#allocation12]  }
 0x2e5   :  { %881 = dma.done.wait [#allocation4], 32  }
 0x2e6   :  { %882 = vsyncadd [#allocation4], 4294967264 }
 0x2e7   :  { %883 = dma.done.wait [#allocation12], 32  }
 0x2e8   :  { %884 = vsyncadd [#allocation12], 4294967264 }
 0x2e9   :  { %610 = vsyncpa [#allocation3], 1 }
 0x2ea   :  { %611 = vsyncpa [#allocation6], 1 }
 0x2eb   :  { %612 = vsyncpa [#allocation9], 1 }
 0x2ec   :  { %613 = vsyncpa [#allocation4], 1 }
 0x2ed   :  { %614 = vsyncpa [#allocation12], 1 }

</bundles_post_ra>
